<compile_context>
chip_gen: v7x
topology: tpu7x:2x2x1
jax: 0.10.0
libtpu: 0.0.40
codegen_flags: <defaults>
</compile_context>

<pallas_src>
import functools

import jax
import jax.numpy as jnp
from jax.experimental import pallas as pl
from jax.experimental.pallas import tpu as pltpu


def _dilated_residual_kernel(x_ref, wf_ref, b1_ref, wp_ref, b2_ref, out_ref,
                             xstk_ref, *, dilation):
    """One (NB, C, T) batch block per grid step.

    x_ref   : (NB, C, T)     f32   input block (NCT, time on lanes)
    wf_ref  : (C, 3*C)       bf16  fused dilated-conv weight [tap0 | tap1 | tap2]
    b1_ref  : (C, 1)         f32   dilated-conv bias
    wp_ref  : (C, C)         bf16  1x1-conv weight
    b2_ref  : (C, 1)         f32   1x1-conv bias
    out_ref : (NB, C, T)     f32   output block
    xstk_ref: (3*C, NB*T)    bf16  scratch: im2col stack of the three taps
    """
    d = dilation
    NB, C, T = x_ref.shape

    # Lane-index masks that zero the wrapped lanes of the rolled taps
    # (this reproduces Conv1d's zero padding = dilation).  Pure VALU, tiny.
    lane = jax.lax.broadcasted_iota(jnp.int32, (C, T), 1)
    mask_prev = lane >= d            # valid where t - d >= 0
    mask_next = lane < (T - d)       # valid where t + d <  T

    # im2col: for each batch element of the block, stack [x[t-d]; x[t]; x[t+d]]
    # along the contraction axis at lane offset b*T.  The +-d shifts go through
    # the XLU rotate (pltpu.roll with non-negative shifts) instead of a padded
    # copy, so there is no xpad buffer and no halo zero-store traffic.
    for b in range(NB):                                   # static unroll (NB small)
        x_b = x_ref[b]                                    # (C, T) f32
        prev = jnp.where(mask_prev, pltpu.roll(x_b, d, axis=1), 0.0)      # x[t-d]
        nxt = jnp.where(mask_next, pltpu.roll(x_b, T - d, axis=1), 0.0)   # x[t+d]
        lo = b * T
        hi = lo + T
        xstk_ref[0:C, lo:hi] = prev.astype(xstk_ref.dtype)
        xstk_ref[C:2 * C, lo:hi] = x_b.astype(xstk_ref.dtype)
        xstk_ref[2 * C:3 * C, lo:hi] = nxt.astype(xstk_ref.dtype)

    # Fused dilated conv: one wide MXU matmul, K = 3*C, lanes = NB*T,
    # f32 accumulation.  (On v5e, where the single vst slot makes the staging
    # stores the first saturating resource, three accumulating K=C matmuls on
    # the rolled taps would be the better trade; v6e/v7x favour this form.)
    h = jnp.dot(wf_ref[...], xstk_ref[...], preferred_element_type=jnp.float32)
    h = jnp.maximum(h + b1_ref[...], 0.0)                 # bias + ReLU in f32

    # 1x1 conv (matmul over channels) + bias: bf16 operands, f32 accumulation.
    y = jnp.dot(wp_ref[...], h.astype(xstk_ref.dtype),
                preferred_element_type=jnp.float32)
    y = y + b2_ref[...]

    # Residual add in f32, lane-dense stores (T a multiple of 128 in the demo).
    for b in range(NB):
        lo = b * T
        out_ref[b] = (x_ref[b] + y[:, lo:lo + T]).astype(out_ref.dtype)


def _pick_batch_block(n, target=8):
    """Largest divisor of n (<= target) that still leaves >= 2 grid slices,
    so both TensorCores get work on v7x.  Falls back to 1."""
    nb = 1
    for cand in range(2, min(target, n) + 1):
        if n % cand == 0 and n // cand >= 2:
            nb = cand
    return nb


def dilated_residual_layer(x_nct, w_dilated, b_dilated, w_1x1, b_1x1, dilation,
                           *, matmul_dtype=jnp.bfloat16, batch_block=None):
    """x_nct: (N, C, T) float32, PyTorch Conv1d (NCT) layout.  Returns (N, C, T) f32."""
    N, C, T = x_nct.shape
    d = int(dilation)
    assert 0 < d < T, "dilation must satisfy 0 < dilation < T"

    NB = batch_block if batch_block is not None else _pick_batch_block(N)
    assert N % NB == 0, "batch block must divide N"

    # One-time (tiny) weight prep: fuse the 3 taps along the contraction axis.
    # PyTorch Conv1d weight is (C_out, C_in, K); tap k multiplies x[t + (k-1)*d].
    wf = jnp.concatenate(
        [w_dilated[:, :, 0], w_dilated[:, :, 1], w_dilated[:, :, 2]],
        axis=1).astype(matmul_dtype)                      # (C, 3*C)
    wp = w_1x1[:, :, 0].astype(matmul_dtype)              # (C, C)
    b1 = b_dilated.reshape(C, 1).astype(jnp.float32)
    b2 = b_1x1.reshape(C, 1).astype(jnp.float32)
    x = x_nct.astype(jnp.float32)

    # Scoped-VMEM budget derived from the actual buffers: double-buffered f32
    # in/out blocks, bf16 im2col scratch, plus f32 temporaries + weights.
    # Capped below v7x's 64 MiB physical VMEM.
    blk = NB * C * T * 4
    est = (2 * blk                    # x block, double-buffered
           + 2 * blk                  # out block, double-buffered
           + 3 * C * NB * T * 2       # im2col scratch (bf16)
           + 4 * blk                  # h / y / tap temporaries headroom
           + (2 << 20))               # weights + misc
    vmem_limit = int(min(64 * 1024 * 1024, max(est, 16 * 1024 * 1024)))

    kernel = functools.partial(_dilated_residual_kernel, dilation=d)

    return pl.pallas_call(
        kernel,
        out_shape=jax.ShapeDtypeStruct((N, C, T), jnp.float32),
        grid=(N // NB,),
        in_specs=[
            pl.BlockSpec((NB, C, T), lambda n: (n, 0, 0)),     # x (NCT)
            pl.BlockSpec((C, 3 * C), lambda n: (0, 0)),        # fused conv weight
            pl.BlockSpec((C, 1), lambda n: (0, 0)),            # conv bias
            pl.BlockSpec((C, C), lambda n: (0, 0)),            # 1x1 weight
            pl.BlockSpec((C, 1), lambda n: (0, 0)),            # 1x1 bias
        ],
        out_specs=pl.BlockSpec((NB, C, T), lambda n: (n, 0, 0)),
        scratch_shapes=[
            pltpu.VMEM((3 * C, NB * T), matmul_dtype),         # im2col stack
        ],
        compiler_params=pltpu.CompilerParams(
            dimension_semantics=("parallel",),
            vmem_limit_bytes=vmem_limit),
    )(x, wf, b1, wp, b2)


def _reference(x_nct, w_dilated, b_dilated, w_1x1, b_1x1, dilation,
               matmul_dtype=jnp.float32):
    """Pure-JAX reference matching PyTorch semantics (eval-mode dropout).

    With matmul_dtype=bf16 it mirrors the kernel's mixed precision
    (bf16 operands, f32 accumulation, f32 bias/ReLU/residual)."""
    d = int(dilation)
    out = jax.lax.conv_general_dilated(
        x_nct.astype(matmul_dtype), w_dilated.astype(matmul_dtype),
        window_strides=(1,), padding=[(d, d)], rhs_dilation=(d,),
        dimension_numbers=("NCH", "OIH", "NCH"),
        preferred_element_type=jnp.float32)
    out = out + b_dilated[None, :, None].astype(jnp.float32)
    out = jnp.maximum(out, 0.0)
    out = jax.lax.conv_general_dilated(
        out.astype(matmul_dtype), w_1x1.astype(matmul_dtype),
        window_strides=(1,), padding=[(0, 0)],
        dimension_numbers=("NCH", "OIH", "NCH"),
        preferred_element_type=jnp.float32)
    out = out + b_1x1[None, :, None].astype(jnp.float32)
    return x_nct.astype(jnp.float32) + out


def _check(N, C, T, dilation, key):
    k_x, k_w1, k_b1, k_w2, k_b2 = jax.random.split(key, 5)
    x = jax.random.normal(k_x, (N, C, T), dtype=jnp.float32)
    w_dilated = jax.random.normal(k_w1, (C, C, 3), dtype=jnp.float32) * 0.1
    b_dilated = jax.random.normal(k_b1, (C,), dtype=jnp.float32) * 0.1
    w_1x1 = jax.random.normal(k_w2, (C, C, 1), dtype=jnp.float32) * 0.1
    b_1x1 = jax.random.normal(k_b2, (C,), dtype=jnp.float32) * 0.1

    out = dilated_residual_layer(x, w_dilated, b_dilated, w_1x1, b_1x1, dilation)
    out = jax.block_until_ready(out)
    assert out.shape == (N, C, T)

    # Tight check vs a reference using the same bf16-operand / f32-accumulate
    # precision as the kernel.
    ref_bf16 = _reference(x, w_dilated, b_dilated, w_1x1, b_1x1, dilation,
                          matmul_dtype=jnp.bfloat16)
    err_bf16 = jnp.max(jnp.abs(out - ref_bf16))
    assert jnp.allclose(out, ref_bf16, atol=5e-3, rtol=5e-3), \
        f"bf16-reference max abs err {err_bf16}"

    # Sanity check vs the full-f32 reference (bounded by bf16 rounding of the
    # conv path; the residual path is exact f32).
    ref_f32 = _reference(x, w_dilated, b_dilated, w_1x1, b_1x1, dilation)
    err_f32 = jnp.max(jnp.abs(out - ref_f32))
    assert jnp.allclose(out, ref_f32, atol=5e-2, rtol=5e-2), \
        f"f32-reference max abs err {err_f32}"


if __name__ == "__main__":
    key = jax.random.PRNGKey(0)
    k0, k1 = jax.random.split(key, 2)

    # Small shapes consistent with the module (MS-TCN style: 64 feature maps).
    _check(N=2, C=64, T=256, dilation=2, key=k0)   # NB=1, grid=(2,)
    _check(N=8, C=64, T=128, dilation=3, key=k1)   # NB=4, grid=(2,) — exercises batching

    print("KERNEL_OK")
</pallas_src>

<mosaic_0001>
module attributes {stable_mosaic.version = 11 : i64} {
  func.func @_dilated_residual_kernel(%arg0: i32, %arg1: memref<1x64x256xf32, #tpu.memory_space<vmem>>, %arg2: memref<64x192xbf16, #tpu.memory_space<vmem>>, %arg3: memref<64x1xf32, #tpu.memory_space<vmem>>, %arg4: memref<64x64xbf16, #tpu.memory_space<vmem>>, %arg5: memref<64x1xf32, #tpu.memory_space<vmem>>, %arg6: memref<1x64x256xf32, #tpu.memory_space<vmem>>, %arg7: memref<192x256xbf16, #tpu.memory_space<vmem>>) attributes {dimension_semantics = [#tpu.dimension_semantics<parallel>], iteration_bounds = array<i64: 2>, scalar_prefetch = 0 : i64, scratch_operands = 1 : i64, tpu.core_type = #tpu.core_type<tc>, window_params = [{transform_indices = @transform_0, window_bounds = array<i64: 1, 64, 256>}, {pipeline_mode = #tpu.pipeline_mode<synchronous>, transform_indices = @transform_1, window_bounds = array<i64: 64, 192>}, {pipeline_mode = #tpu.pipeline_mode<synchronous>, transform_indices = @transform_2, window_bounds = array<i64: 64, 1>}, {pipeline_mode = #tpu.pipeline_mode<synchronous>, transform_indices = @transform_3, window_bounds = array<i64: 64, 64>}, {pipeline_mode = #tpu.pipeline_mode<synchronous>, transform_indices = @transform_4, window_bounds = array<i64: 64, 1>}, {transform_indices = @transform_5, window_bounds = array<i64: 1, 64, 256>}]} {
    %0 = tpu.iota {dimensions = array<i32: 1>} : vector<64x256xi32>
    %c2_i32 = arith.constant 2 : i32
    %1 = vector.broadcast %c2_i32 : i32 to vector<64x256xi32>
    %2 = arith.cmpi sge, %0, %1 : vector<64x256xi32>
    %c254_i32 = arith.constant 254 : i32
    %3 = vector.broadcast %c254_i32 : i32 to vector<64x256xi32>
    %4 = arith.cmpi slt, %0, %3 : vector<64x256xi32>
    %c0 = arith.constant 0 : index
    %c0_0 = arith.constant 0 : index
    %c0_1 = arith.constant 0 : index
    %5 = vector.load %arg1[%c0, %c0_0, %c0_1] : memref<1x64x256xf32, #tpu.memory_space<vmem>>, vector<1x64x256xf32>
    %6 = vector.shape_cast %5 : vector<1x64x256xf32> to vector<64x256xf32>
    %c2_i32_2 = arith.constant 2 : i32
    %7 = tpu.dynamic_rotate %6 by %c2_i32_2 dim 1 : vector<64x256xf32>, i32 -> vector<64x256xf32>
    %cst = arith.constant 0.000000e+00 : f32
    %8 = vector.broadcast %cst : f32 to vector<64x256xf32>
    %9 = arith.select %2, %7, %8 : vector<64x256xi1>, vector<64x256xf32>
    %c254_i32_3 = arith.constant 254 : i32
    %10 = tpu.dynamic_rotate %6 by %c254_i32_3 dim 1 : vector<64x256xf32>, i32 -> vector<64x256xf32>
    %cst_4 = arith.constant 0.000000e+00 : f32
    %11 = vector.broadcast %cst_4 : f32 to vector<64x256xf32>
    %12 = arith.select %4, %10, %11 : vector<64x256xi1>, vector<64x256xf32>
    %13 = arith.truncf %9 : vector<64x256xf32> to vector<64x256xbf16>
    %c0_5 = arith.constant 0 : index
    %c0_6 = arith.constant 0 : index
    %14 = vector.load %arg7[%c0_5, %c0_6] : memref<192x256xbf16, #tpu.memory_space<vmem>>, vector<64x256xbf16>
    tpu.vector_store %arg7[%c0_5, %c0_6], %13 {strides = array<i32>} : memref<192x256xbf16, #tpu.memory_space<vmem>>, vector<64x256xbf16>,
    %15 = arith.truncf %6 : vector<64x256xf32> to vector<64x256xbf16>
    %c64 = arith.constant 64 : index
    %c0_7 = arith.constant 0 : index
    %16 = vector.load %arg7[%c64, %c0_7] : memref<192x256xbf16, #tpu.memory_space<vmem>>, vector<64x256xbf16>
    tpu.vector_store %arg7[%c64, %c0_7], %15 {strides = array<i32>} : memref<192x256xbf16, #tpu.memory_space<vmem>>, vector<64x256xbf16>,
    %17 = arith.truncf %12 : vector<64x256xf32> to vector<64x256xbf16>
    %c128 = arith.constant 128 : index
    %c0_8 = arith.constant 0 : index
    %18 = vector.load %arg7[%c128, %c0_8] : memref<192x256xbf16, #tpu.memory_space<vmem>>, vector<64x256xbf16>
    tpu.vector_store %arg7[%c128, %c0_8], %17 {strides = array<i32>} : memref<192x256xbf16, #tpu.memory_space<vmem>>, vector<64x256xbf16>,
    %c0_9 = arith.constant 0 : index
    %c0_10 = arith.constant 0 : index
    %19 = vector.load %arg2[%c0_9, %c0_10] : memref<64x192xbf16, #tpu.memory_space<vmem>>, vector<64x192xbf16>
    %c0_11 = arith.constant 0 : index
    %c0_12 = arith.constant 0 : index
    %20 = vector.load %arg7[%c0_11, %c0_12] : memref<192x256xbf16, #tpu.memory_space<vmem>>, vector<192x256xbf16>
    %cst_13 = arith.constant dense<0.000000e+00> : vector<64x256xf32>
    %21 = tpu.matmul %19, %20, %cst_13 {dimension_numbers = #tpu.dot_dimension_numbers<[1], [0], [0], [1], [0, 0, 1, 1], [], []>} : vector<64x192xbf16>, vector<192x256xbf16>, vector<64x256xf32> -> vector<64x256xf32>
    %c0_14 = arith.constant 0 : index
    %c0_15 = arith.constant 0 : index
    %22 = vector.load %arg3[%c0_14, %c0_15] : memref<64x1xf32, #tpu.memory_space<vmem>>, vector<64x1xf32>
    %23 = vector.broadcast %22 : vector<64x1xf32> to vector<64x256xf32>
    %24 = arith.addf %21, %23 : vector<64x256xf32>
    %cst_16 = arith.constant 0.000000e+00 : f32
    %25 = vector.broadcast %cst_16 : f32 to vector<64x256xf32>
    %26 = arith.maximumf %24, %25 : vector<64x256xf32>
    %c0_17 = arith.constant 0 : index
    %c0_18 = arith.constant 0 : index
    %27 = vector.load %arg4[%c0_17, %c0_18] : memref<64x64xbf16, #tpu.memory_space<vmem>>, vector<64x64xbf16>
    %28 = arith.truncf %26 : vector<64x256xf32> to vector<64x256xbf16>
    %cst_19 = arith.constant dense<0.000000e+00> : vector<64x256xf32>
    %29 = tpu.matmul %27, %28, %cst_19 {dimension_numbers = #tpu.dot_dimension_numbers<[1], [0], [0], [1], [0, 0, 1, 1], [], []>} : vector<64x64xbf16>, vector<64x256xbf16>, vector<64x256xf32> -> vector<64x256xf32>
    %c0_20 = arith.constant 0 : index
    %c0_21 = arith.constant 0 : index
    %30 = vector.load %arg5[%c0_20, %c0_21] : memref<64x1xf32, #tpu.memory_space<vmem>>, vector<64x1xf32>
    %31 = vector.broadcast %30 : vector<64x1xf32> to vector<64x256xf32>
    %32 = arith.addf %29, %31 : vector<64x256xf32>
    %c0_22 = arith.constant 0 : index
    %c0_23 = arith.constant 0 : index
    %c0_24 = arith.constant 0 : index
    %33 = vector.load %arg1[%c0_22, %c0_23, %c0_24] : memref<1x64x256xf32, #tpu.memory_space<vmem>>, vector<1x64x256xf32>
    %34 = vector.shape_cast %33 : vector<1x64x256xf32> to vector<64x256xf32>
    %35 = arith.addf %34, %32 : vector<64x256xf32>
    %c0_25 = arith.constant 0 : index
    %c0_26 = arith.constant 0 : index
    %c0_27 = arith.constant 0 : index
    %36 = vector.load %arg6[%c0_25, %c0_26, %c0_27] : memref<1x64x256xf32, #tpu.memory_space<vmem>>, vector<1x64x256xf32>
    %37 = vector.shape_cast %36 : vector<1x64x256xf32> to vector<64x256xf32>
    %38 = vector.shape_cast %35 : vector<64x256xf32> to vector<1x64x256xf32>
    tpu.vector_store %arg6[%c0_25, %c0_26, %c0_27], %38 {strides = array<i32>} : memref<1x64x256xf32, #tpu.memory_space<vmem>>, vector<1x64x256xf32>,
    return
  }
  func.func @transform_0(%arg0: i32) -> (i32, i32, i32) {
    %c0_i32 = arith.constant 0 : i32
    %c0_i32_0 = arith.constant 0 : i32
    %c0_i32_1 = arith.constant 0 : i32
    return %arg0, %c0_i32, %c0_i32_0 : i32, i32, i32
  }
  func.func @transform_1(%arg0: i32) -> (i32, i32) {
    %c0_i32 = arith.constant 0 : i32
    %c0_i32_0 = arith.constant 0 : i32
    %c0_i32_1 = arith.constant 0 : i32
    return %c0_i32, %c0_i32_0 : i32, i32
  }
  func.func @transform_2(%arg0: i32) -> (i32, i32) {
    %c0_i32 = arith.constant 0 : i32
    %c0_i32_0 = arith.constant 0 : i32
    %c0_i32_1 = arith.constant 0 : i32
    return %c0_i32, %c0_i32_0 : i32, i32
  }
  func.func @transform_3(%arg0: i32) -> (i32, i32) {
    %c0_i32 = arith.constant 0 : i32
    %c0_i32_0 = arith.constant 0 : i32
    %c0_i32_1 = arith.constant 0 : i32
    return %c0_i32, %c0_i32_0 : i32, i32
  }
  func.func @transform_4(%arg0: i32) -> (i32, i32) {
    %c0_i32 = arith.constant 0 : i32
    %c0_i32_0 = arith.constant 0 : i32
    %c0_i32_1 = arith.constant 0 : i32
    return %c0_i32, %c0_i32_0 : i32, i32
  }
  func.func @transform_5(%arg0: i32) -> (i32, i32, i32) {
    %c0_i32 = arith.constant 0 : i32
    %c0_i32_0 = arith.constant 0 : i32
    %c0_i32_1 = arith.constant 0 : i32
    return %arg0, %c0_i32, %c0_i32_0 : i32, i32, i32
  }
}

</mosaic_0001>

<bundles_post_ra>
// kernel: tpu_custom_call.1
= control target key start
LH: loop header
LB: loop body
LE: loop exit
PB: predicated region body
PF: predicated region fallthrough
CT: control target
= control target key end

     0   :  { %10 = vsyncpa [#allocation4], 0  ;;  %s1772_s0 = inlined_call_operand.hbm [shape: f32[2,64,256], index: 0, kind: input, shape index: {}]   ;;  %s1773_s1 = inlined_call_operand.vmem [shape: bf16[64,192], index: 1, kind: input, shape index: {}]   ;;  %s1774_s2 = inlined_call_operand.vmem [shape: f32[64,1], index: 2, kind: input, shape index: {}]   ;;  %s1775_s3 = inlined_call_operand.vmem [shape: bf16[64,64], index: 3, kind: input, shape index: {}]   ;;  %s1776_s4 = inlined_call_operand.vmem [shape: f32[64,1], index: 4, kind: input, shape index: {}]   ;;  %s1777_s5 = inlined_call_operand.hbm [shape: f32[2,64,256], index: 5, kind: output, shape index: {}]  }
   0x1   :  { %12 = vsyncpa [#allocation4 + $0x1], 0 }
   0x2   :  { %13 = vsyncpa [#allocation5], 0 }
   0x3   :  { %15 = vsyncpa [#allocation5 + $0x1], 0  ;;  %s1315_s18 = smov 0   ;;  %s1317_s19 = smov 0  }
   0x4   :  { %s1319_s20 = smov 0   ;;  %s1321_s21 = smov 0  }
   0x5 LB: > { %s1336_s22 = sadd.s32 4294967295, %s1274_s21   ;;  %s967_s23 = sadd.s32 4294967294, %s1274_s21   ;;  %s1274_s21 = sphi %s1321_s21, %s1794_s21   ;;  %s1270_s20 = sphi %s1319_s20, %s1793_s20   ;;  %s1266_s19 = sphi %s1317_s19, %s1792_s19   ;;  %s1262_s18 = sphi %s1315_s18, %s1791_s18  }
   0x6   : > { %s1340_s24 = sadd.s32 1, %s1274_s21   ;;  %s28_s25 = sadd.s32 1, %s1270_s20 }
   0x7   : > { %s25_s26 = ssub.s32 %s1274_s21, %s1340_s24  ;;  %p35_p0 = scmp.ne.s32.totalorder %s1270_s20, %s1266_s19 }
   0x8   : > { %p26_p1 = scmp.eq.s32.totalorder %s25_s26, 0  ;;  %p36_p2 = scmp.eq.s32.totalorder %s1274_s21, 0 }
   0x9   : > { %p41_p3 = scmp.ne.s32.totalorder %s1266_s19, %s1262_s18  ;;  %p42_p4 = scmp.eq.s32.totalorder %s1336_s22, 0 }
   0xa   : > { %s1352_s27 = scalar_select %p26_p1, %s1270_s20, %s28_s25  }
   0xb   : > { %p1354_p5 = por %p36_p2, %p35_p0  ;;  %p1358_p6 = por %p42_p4, %p41_p3 }
   0xc   : > { %p149_p7 = scmp.eq.s32.totalorder %s1336_s22, 1  ;;  %p155_p8 = scmp.eq.s32.totalorder %s967_s23, 1 }
   0xd   : > { %p1039_p10 = scmp.lt.s32.totalorder %s1274_s21, 2  ;;  %s187_s7 = sand.u32 1, %s1270_s20  }
   0xe   : > { %p1365_p11 = por %p149_p7, %p35_p0  ;;  %p1369_p12 = por %p155_p8, %p41_p3 }
   0xf   : > { %s1001_s8 = sshll.u32 %s1274_s21, 11  ;;  %s970_s9 = sshll.u32 %s187_s7, 7 }
  0x10   : > { %s1781_s30 = scalar_select %p1365_p11, 1, 0 }
  0x11   : > { %s1782_s6 = scalar_select %p1369_p12, 1, 0 }
  0x12   : > { %s1378_s12 = scalar_lea.hbm %s1772_s0, %s1001_s8  ;;  %s191_s13 = scalar_lea.vmem [#allocation3], %s970_s9 }
  0x13   : > { %s198_s14 = sshll.u32 %s191_s13, 4  ;;  %p1382_p13 = pnand %p1039_p10, %p1354_p5  ;;  %s1386_s14 = int_to_ptr.vmem [resolvable:$true] %s198_s14 }
  0x14   : > { %s1388_s16 = scalar_lea.sflag [#allocation4], %s187_s7  ;;  %s1178_s17 = scalar_lea.hbm %s1378_s12, 2048 }
  0x15   : > { %p1179_p0 = scmp.ne.s32.totalorder %s1378_s12, %s1178_s17  ;;  %p1180_p1 = pneg %p1382_p13 }
  0x16   : > { %s1183_s26 = scalar_lea.hbm %s1772_s0, 4096  ;;  %p1184_p4 = scmp.lt.u32.totalorder %s1378_s12, %s1772_s0 }
  0x17   : > { %p1181_p2 = pnand %p1180_p1, %p1179_p0  ;;  %p1185_p5 = scmp.lt.u32.totalorder %s1183_s26, %s1178_s17 }
  0x18   : > { %p1187_p8 = scmp.lt.u32.totalorder %s1178_s17, %s1378_s12 }
  0x19   : > { %p1182_p3 = pneg %p1181_p2  ;;  %p1186_p7 = por %p1185_p5, %p1184_p4 }
  0x1b   : > { %p1188_p10 = por %p1187_p8, %p1186_p7 }
  0x1d   : > { %p1189_p9 = pnand %p1188_p10, %p1182_p3 }
  0x1f   : > { %1192 = shalt.err (!%p1189_p9)
}
  0x20   : > { %s1193_s7 = scalar_lea.vmem %s1386_s14, 2048  ;;  %s1276_s9 = smov [#allocation3]  }
  0x21   : > { %p1194_p0 = scmp.ne.s32.totalorder %s1386_s14, %s1193_s7  ;;  %s1198_s10 = sshll.u32 %s1276_s9, 4  ;;  %s1199_s10 = int_to_ptr.vmem [resolvable:$false] %s1198_s10 }
  0x22   : > { %s1200_s11 = scalar_lea.vmem %s1199_s10, 4096  ;;  %p1201_p11 = scmp.lt.s32.totalorder %s1386_s14, %s1199_s10 }
  0x23   : > { %p1196_p2 = pnand %p1194_p0, %p1180_p1  ;;  %p1202_p4 = scmp.lt.s32.totalorder %s1200_s11, %s1193_s7 }
  0x25   : > { %p1197_p12 = pneg %p1196_p2  ;;  %p1203_p5 = por %p1202_p4, %p1201_p11 }
  0x27   : > { %p1204_p7 = pnand %p1203_p5, %p1197_p12 }
  0x29   : > { %1207 = shalt.err (!%p1204_p7)
}
  0x2a   : > { %s1277_s13 = smov 256   ;;  %s1278_s17 = smov 16  }
  0x2b   : > { %1034 = dma.hbm_to_vmem [thread:$0]  (!%p1382_p13), %s1378_s12, 2048, %s1386_s14, %s1388_s16, %s1277_s13, %s1277_s13, %s1278_s17  }
  0x2c   : > { %p973_p9 = scmp.ge.s32.totalorder %s1274_s21, 1  ;;  %p206_p1 = scmp.lt.s32.totalorder %s1274_s21, 3 }
  0x2e   : > { %p207_p3 = pnand %p973_p9, %p206_p1 }
  0x2f   : > { %s1419_s23 = sand.u32 (!%p207_p3), 1, %s1266_s19  }
  0x30   : > { %210 = sbr.rel (%p207_p3) target bundleno = 739 (0x2e3), region = 40  ;;  %s974_s25 = sshll.u32 (!%p207_p3), %s1419_s23, 7 }
  0x31   : > { %s213_s26 = scalar_lea.sflag (!%p207_p3), [#allocation4], %s1419_s23  ;;  %s216_s28 = scalar_lea.vmem (!%p207_p3), [#allocation3], %s974_s25 }
  0x37   : > { %1253 = dma.done.wait (%p1358_p6), %s213_s26, 2048  }
  0x38   : > { %1255 = vsyncadd (%p1358_p6), %s213_s26, 4294965248  ;;  %v1429_v0 = vld [vmem:[%s216_s28 + $0x20] sm:$0xff]  ;;  %v1431_v1 = vld [vmem:[%s216_s28 + $0x30] sm:$0xff]  ;;  %s1279_s29 = smov 2   ;;  %s1280_s12 = smov 126   ;;  %vm561_vm0 = vcmask 523264   ;;  %v244_v42 = vlaneseq }
  0x39   : > { %v1433_v2 = vld [vmem:[%s216_s28] sm:$0xff]  ;;  %v1090_v3 = vpack.i.bf16 %v1431_v1, %v1429_v0  ;;  %v1437_v4 = vld [vmem:[%s216_s28 + $0x10] sm:$0xff]  ;;  %v1439_v5 = vld [vmem:[%s216_s28 + $0x28] sm:$0xff]  ;;  %v1281_v27 = vmov 0   ;;  %s1689_s14 = scalar_lea.vmem [#allocation6], %s974_s25  ;;  %s1002_s25 = sshll.u32 %s1336_s22, 11 }
  0x3a   : > { %v1441_v6 = vld [vmem:[%s216_s28 + $0x38] sm:$0xff]  ;;  %v1080_v7 = vpack.i.bf16 %v1437_v4, %v1433_v2  ;;  %v1445_v8 = vld [vmem:[%s216_s28 + $0x8] sm:$0xff]  ;;  %v1457_v14 = vld [vmem:[%s216_s28 + $0x40] sm:$0xff]  ;;  %1161 = vset.pattern.permute.xlu1 %v1281_v27  ;;  %1160 = vset.pattern.permute.xlu0 %v1281_v27  ;;  %v1532_v44 = vand.u32 127, %v244_v42  ;;  %s894_s15 = sshll.u32 %s1689_s14, 4  ;;  %s1722_s7 = scalar_lea.hbm %s1777_s5, %s1002_s25  ;;  %s1724_s15 = int_to_ptr.vmem [resolvable:$true] %s894_s15 }
  0x3b   : > { %v1447_v9 = vld [vmem:[%s216_s28 + $0x18] sm:$0xff]  ;;  %1091 = vrot.lane.b32.xlu1 %v1090_v3, %s1279_s29  ;;  %v1095_v10 = vpack.i.bf16 %v1441_v6, %v1439_v5  ;;  %v1453_v12 = vld [vmem:[%s216_s28 + $0x48] sm:$0xff]  ;;  %v1459_v15 = vld [vmem:[%s216_s28 + $0x50] sm:$0xff]  ;;  %791 = vmatprep.mubr.bf16.mxu1 %v1281_v27  ;;  %s881_s22 = scalar_lea.sflag [#allocation5], %s1419_s23  ;;  %s1208_s9 = scalar_lea.vmem %s1724_s15, 2048 }
  0x3c   : > { %1081 = vrot.lane.b32.xlu0 %v1080_v7, %s1279_s29  ;;  %v1085_v11 = vpack.i.bf16 %v1447_v9, %v1445_v8  ;;  %v1455_v13 = vld [vmem:[%s216_s28 + $0x58] sm:$0xff]  ;;  %v1461_v16 = vld [vmem:[%s216_s28 + $0x68] sm:$0xff]  ;;  %v1467_v19 = vld [vmem:[%s216_s28 + $0x60] sm:$0xff]  ;;  %v1100_v21 = vpack.i.bf16 %v1459_v15, %v1457_v14  ;;  %vm299_vm1 = vcmp.lt.s32.totalorder %v1532_v44, 2  ;;  %vm247_vm2 = vcmp.ge.s32.totalorder %v1532_v44, 2  ;;  %p1209_p6 = scmp.ne.s32.totalorder %s1724_s15, %s1208_s9  ;;  %p1788_p11 = scmp.ne.s32.totalorder %s1781_s30, 0 }
  0x3d   : > { %v1463_v17 = vld [vmem:[%s216_s28 + $0x78] sm:$0xff]  ;;  %v1105_v18 = vpack.i.bf16 %v1455_v13, %v1453_v12  ;;  %v1469_v20 = vld [vmem:[%s216_s28 + $0x70] sm:$0xff]  ;;  %v1164_v24 = vld [vmem:[%s1773_s1 + $0x4] ss:$8 sps:$4 sm:$0xff]   ;;  %vm364_vm4 = vcmp.lt.s32.totalorder %v1532_v44, 126  ;;  %s1282_s10 = smov [#allocation6]  }
  0x3e   : > { %v1115_v22 = vpack.i.bf16 %v1463_v17, %v1461_v16  ;;  %v1110_v23 = vpack.i.bf16 %v1469_v20, %v1467_v19  ;;  %984 = vmatprep.mubr.msk.bf16.mxu0 %vm561_vm0, %v1164_v24  ;;  %v478_v25 = vld [vmem:[%s1774_s2 + $0x8] sm:$0xff]  ;;  %v477_v26 = vld [vmem:[%s1774_s2] sm:$0xff]  ;;  %v479_v28 = vld [vmem:[%s1774_s2 + $0x10] sm:$0xff]  ;;  %p1210_p12 = pnand %p1209_p6, %p1788_p11  ;;  %s1212_s11 = sshll.u32 %s1282_s10, 4  ;;  %s1213_s11 = int_to_ptr.vmem [resolvable:$false] %s1212_s11 }
  0x3f   : > { %1096 = vrot.lane.b32.xlu1 %v1095_v10, %s1279_s29  ;;  %v480_v29 = vld [vmem:[%s1774_s2 + $0x18] sm:$0xff]  ;;  %v481_v30 = vld [vmem:[%s1774_s2 + $0x20] sm:$0xff]  ;;  %v482_v31 = vld [vmem:[%s1774_s2 + $0x28] sm:$0xff]  ;;  %s1214_s13 = scalar_lea.vmem %s1213_s11, 4096  ;;  %p1215_p8 = scmp.lt.s32.totalorder %s1724_s15, %s1213_s11 }
  0x40   : > { %1086 = vrot.lane.b32.xlu0 %v1085_v11, %s1279_s29  ;;  %v483_v32 = vld [vmem:[%s1774_s2 + $0x30] sm:$0xff]  ;;  %v484_v33 = vld [vmem:[%s1774_s2 + $0x38] sm:$0xff]  ;;  %v679_v34 = vld [vmem:[%s1776_s4] sm:$0xff]  ;;  %p1211_p13 = pneg %p1210_p12  ;;  %p1216_p10 = scmp.lt.s32.totalorder %s1214_s13, %s1208_s9 }
  0x41   : > { %v680_v35 = vld [vmem:[%s1776_s4 + $0x8] sm:$0xff]  ;;  %v681_v36 = vld [vmem:[%s1776_s4 + $0x10] sm:$0xff]  ;;  %v682_v37 = vld [vmem:[%s1776_s4 + $0x18] sm:$0xff] }
  0x42   : > { %v683_v38 = vld [vmem:[%s1776_s4 + $0x20] sm:$0xff]  ;;  %v684_v39 = vld [vmem:[%s1776_s4 + $0x28] sm:$0xff]  ;;  %v685_v40 = vld [vmem:[%s1776_s4 + $0x30] sm:$0xff]  ;;  %p1217_p0 = por %p1216_p10, %p1215_p8 }
  0x43   : > { %1106 = vrot.lane.b32.xlu1 %v1105_v18, %s1279_s29  ;;  %v686_v41 = vld [vmem:[%s1776_s4 + $0x38] sm:$0xff]  ;;  %vm1548_vm3 = vmpackc.low %vm247_vm2, %vm247_vm2 }
  0x44   : > { %1101 = vrot.lane.b32.xlu0 %v1100_v21, %s1279_s29  ;;  %p1218_p2 = pnand %p1217_p0, %p1211_p13 }
  0x47   : > { %1116 = vrot.lane.b32.xlu1 %v1115_v22, %s1279_s29 }
  0x48   : > { %1111 = vrot.lane.b32.xlu0 %v1110_v23, %s1279_s29 }
  0x4b   : > { %1126 = vrot.lane.b32.xlu1 %v1085_v11, %s1280_s12 }
  0x4c   : > { %1121 = vrot.lane.b32.xlu0 %v1080_v7, %s1280_s12 }
  0x4f   : > { %1136 = vrot.lane.b32.xlu1 %v1095_v10, %s1280_s12 }
  0x50   : > { %1131 = vrot.lane.b32.xlu0 %v1090_v3, %s1280_s12  ;;  %v420_v3 = vpack.c.bf16 %v1463_v17, %v1461_v16 }
  0x53   : > { %1146 = vrot.lane.b32.xlu1 %v1105_v18, %s1280_s12 }
  0x54   : > { %1141 = vrot.lane.b32.xlu0 %v1100_v21, %s1280_s12 }
  0x57   : > { %1156 = vrot.lane.b32.xlu1 %v1115_v22, %s1280_s12 }
  0x58   : > { %1151 = vrot.lane.b32.xlu0 %v1110_v23, %s1280_s12 }
  0x5b   : > { %492 = vperm.xlu1 %1161, %v478_v25  }
  0x5c   : > { %487 = vperm.xlu0 %1160, %v477_v26  }
  0x5f   : > { %497 = vperm.xlu1 %1161, %v479_v28  }
  0x60   : > { %502 = vperm.xlu0 %1160, %v480_v29  }
  0x63   : > { %507 = vperm.xlu1 %1161, %v481_v30  }
  0x64   : > { %512 = vperm.xlu0 %1160, %v482_v31  }
  0x67   : > { %517 = vperm.xlu1 %1161, %v483_v32  }
  0x68   : > { %522 = vperm.xlu0 %1160, %v484_v33  }
  0x6b   : > { %689 = vperm.xlu1 %1161, %v679_v34  }
  0x6c   : > { %694 = vperm.xlu0 %1160, %v680_v35  }
  0x6f   : > { %699 = vperm.xlu1 %1161, %v681_v36  }
  0x70   : > { %704 = vperm.xlu0 %1160, %v682_v37  }
  0x73   : > { %709 = vperm.xlu1 %1161, %v683_v38  }
  0x74   : > { %714 = vperm.xlu0 %1160, %v684_v39  }
  0x77   : > { %719 = vperm.xlu1 %1161, %v685_v40  }
  0x78   : > { %724 = vperm.xlu0 %1160, %v686_v41  }
  0xad   : > { %v1092_v43 = vpop.permute.xlu1 %1091 }
  0xae   : > { %v1082_v45 = vpop.permute.xlu0 %1081  ;;  %v1093_v46 = vunpack.i.l.bf16 %v1092_v43  ;;  %v1094_v47 = vunpack.i.h.bf16 %v1092_v43 }
  0xaf   : > { %v1084_v52 = vunpack.i.h.bf16 %v1082_v45  ;;  %v1083_v53 = vunpack.i.l.bf16 %v1082_v45 }
  0xb1   : > { %v1097_v48 = vpop.permute.xlu1 %1096 }
  0xb2   : > { %v1099_v49 = vunpack.i.h.bf16 %v1097_v48  ;;  %v1098_v50 = vunpack.i.l.bf16 %v1097_v48  ;;  %v1087_v51 = vpop.permute.xlu0 %1086 }
  0xb3   : > { %v1089_v54 = vunpack.i.h.bf16 %v1087_v51  ;;  %v1088_v55 = vunpack.i.l.bf16 %v1087_v51  ;;  %v416_v51 = vpack.c.bf16 %v1441_v6, %v1439_v5 }
  0xb4   : > { %v302_v56 = vsel %vm299_vm1, %v1093_v46, %v1098_v50  ;;  %v303_v61 = vsel %vm299_vm1, %v1094_v47, %v1099_v49  ;;  %v310_v23 = vsel %vm299_vm1, %v1098_v50, %v1093_v46  ;;  %v311_v24 = vsel %vm299_vm1, %v1099_v49, %v1094_v47 }
  0xb5   : > { %v300_v57 = vsel %vm299_vm1, %v1083_v53, %v1088_v55  ;;  %v301_v58 = vsel %vm299_vm1, %v1084_v52, %v1089_v54  ;;  %v308_v59 = vsel %vm299_vm1, %v1088_v55, %v1083_v53  ;;  %v1107_v60 = vpop.permute.xlu1 %1106  ;;  %v309_v63 = vsel %vm299_vm1, %v1089_v54, %v1084_v52 }
  0xb6   : > { %v398_v62 = vpack.c.bf16 %v301_v58, %v300_v57  ;;  %v1109_v7 = vunpack.i.h.bf16 %v1107_v60  ;;  %v1108_v10 = vunpack.i.l.bf16 %v1107_v60  ;;  %v1102_v11 = vpop.permute.xlu0 %1101  ;;  %v1004_v18 = vpack.c.bf16 %v309_v63, %v308_v59 }
  0xb7   : > { %v1104_v21 = vunpack.i.h.bf16 %v1102_v11  ;;  %v1103_v22 = vunpack.i.l.bf16 %v1102_v11  ;;  %v400_v25 = vpack.c.bf16 %v303_v61, %v302_v56  ;;  %v1007_v36 = vpack.c.bf16 %v311_v24, %v310_v23 }
  0xb8   : > { %574 = vmatprep.subr.bf16.mxu0 %v398_v62  ;;  %v414_v47 = vpack.c.bf16 %v1447_v9, %v1445_v8  ;;  %v413_v50 = vpack.c.bf16 %v1437_v4, %v1433_v2  ;;  %v415_v54 = vpack.c.bf16 %v1431_v1, %v1429_v0  ;;  %v418_v55 = vpack.c.bf16 %v1455_v13, %v1453_v12 }
  0xb9   : > { %1005 = vmatpush1.bf16.msk.msra.mxu0 %vm1548_vm3, %v1004_v18  ;;  %v313_v26 = vsel %vm299_vm1, %v1109_v7, %v1104_v21  ;;  %v1117_v28 = vpop.permute.xlu1 %1116  ;;  %v304_v29 = vsel %vm299_vm1, %v1103_v22, %v1108_v10  ;;  %v305_v30 = vsel %vm299_vm1, %v1104_v21, %v1109_v7  ;;  %v312_v31 = vsel %vm299_vm1, %v1108_v10, %v1103_v22 }
  0xba   : > { %576 = vmatprep.subr.bf16.mxu0 %v400_v25  ;;  %v1119_v32 = vunpack.i.h.bf16 %v1117_v28  ;;  %v1118_v33 = vunpack.i.l.bf16 %v1117_v28  ;;  %v1112_v34 = vpop.permute.xlu0 %1111  ;;  %v402_v35 = vpack.c.bf16 %v305_v30, %v304_v29  ;;  %v1010_v39 = vpack.c.bf16 %v313_v26, %v312_v31 }
  0xbb   : > { %v1114_v37 = vunpack.i.h.bf16 %v1112_v34  ;;  %v1113_v38 = vunpack.i.l.bf16 %v1112_v34  ;;  %v246_v60 = vadd.s32 128, %v1532_v44  ;;  %v417_v61 = vpack.c.bf16 %v1459_v15, %v1457_v14  ;;  %v1167_v44 = vld [vmem:[%s1773_s1 + $0x10] ss:$8 sps:$4 sm:$0xff]  }
  0xbc   : > { %v419_v24 = vpack.c.bf16 %v1469_v20, %v1467_v19 }
  0xbd   : > { %1008 = vmatpush1.bf16.msk.msra.mxu0 %vm1548_vm3, %v1007_v36  ;;  %v306_v40 = vsel %vm299_vm1, %v1113_v38, %v1118_v33  ;;  %v307_v41 = vsel %vm299_vm1, %v1114_v37, %v1119_v32  ;;  %v315_v42 = vsel %vm299_vm1, %v1119_v32, %v1114_v37  ;;  %v314_v43 = vsel %vm299_vm1, %v1118_v33, %v1113_v38  ;;  %v1127_v48 = vpop.permute.xlu1 %1126 }
  0xbe   : > { %578 = vmatprep.subr.bf16.mxu0 %v402_v35  ;;  %v404_v45 = vpack.c.bf16 %v307_v41, %v306_v40  ;;  %v1013_v46 = vpack.c.bf16 %v315_v42, %v314_v43  ;;  %v1122_v49 = vpop.permute.xlu0 %1121  ;;  %v1129_v56 = vunpack.i.h.bf16 %v1127_v48  ;;  %v1128_v57 = vunpack.i.l.bf16 %v1127_v48 }
  0xbf   : > { %v1124_v58 = vunpack.i.h.bf16 %v1122_v49  ;;  %v1123_v59 = vunpack.i.l.bf16 %v1122_v49  ;;  %vm250_vm5 = vcmp.lt.s32.totalorder %v246_v60, 254  ;;  %v1165_v60 = vld [vmem:[%s1773_s1 + $0x14] ss:$8 sps:$4 sm:$0xff]  }
  0xc0   : > { %vm1610_vm6 = vmpackc.low %vm250_vm5, %vm250_vm5 }
  0xc1   : > { %1011 = vmatpush1.bf16.msk.msra.mxu0 %vm1548_vm3, %v1010_v39  ;;  %v1137_v52 = vpop.permute.xlu1 %1136  ;;  %v374_v62 = vsel %vm364_vm4, %v1129_v56, %v1124_v58  ;;  %v373_v63 = vsel %vm364_vm4, %v1128_v57, %v1123_v59  ;;  %v365_v25 = vsel %vm364_vm4, %v1123_v59, %v1128_v57  ;;  %v366_v26 = vsel %vm364_vm4, %v1124_v58, %v1129_v56  ;;  %v1162_v59 = vld [vmem:[%s1773_s1] ss:$8 sps:$4 sm:$0xff]  }
  0xc2   : > { %580 = vmatprep.subr.bf16.mxu0 %v404_v45  ;;  %v1132_v53 = vpop.permute.xlu0 %1131  ;;  %v1139_v11 = vunpack.i.h.bf16 %v1137_v52  ;;  %v1138_v18 = vunpack.i.l.bf16 %v1137_v52  ;;  %v1016_v23 = vpack.c.bf16 %v374_v62, %v373_v63  ;;  %v429_v37 = vpack.c.bf16 %v366_v26, %v365_v25  ;;  %v1170_v62 = vld [vmem:[%s1773_s1 + $0x20] ss:$8 sps:$4 sm:$0xff]   ;;  %v1171_v63 = vld [vmem:[%s1773_s1 + $0x34] ss:$8 sps:$4 sm:$0xff]  }
  0xc3   : > { %v1134_v21 = vunpack.i.h.bf16 %v1132_v53  ;;  %v1133_v22 = vunpack.i.l.bf16 %v1132_v53 }
  0xc5   : > { %1014 = vmatpush1.bf16.msk.msra.mxu0 %vm1548_vm3, %v1013_v46  ;;  %v1147_v7 = vpop.permute.xlu1 %1146  ;;  %v376_v32 = vsel %vm364_vm4, %v1139_v11, %v1134_v21  ;;  %v375_v33 = vsel %vm364_vm4, %v1138_v18, %v1133_v22  ;;  %v367_v38 = vsel %vm364_vm4, %v1133_v22, %v1138_v18  ;;  %v368_v42 = vsel %vm364_vm4, %v1134_v21, %v1139_v11 }
  0xc6   : > { %582 = vmatprep.subr.bf16.mxu0 %v414_v47  ;;  %v1142_v10 = vpop.permute.xlu0 %1141  ;;  %v1149_v28 = vunpack.i.h.bf16 %v1147_v7  ;;  %v1148_v29 = vunpack.i.l.bf16 %v1147_v7  ;;  %v1019_v39 = vpack.c.bf16 %v376_v32, %v375_v33  ;;  %v431_v48 = vpack.c.bf16 %v368_v42, %v367_v38 }
  0xc7   : > { %v1144_v30 = vunpack.i.h.bf16 %v1142_v10  ;;  %v1143_v31 = vunpack.i.l.bf16 %v1142_v10 }
  0xc9   : > { %583 = vmatpush1.bf16.msra.mxu0 %v413_v50  ;;  %v1157_v35 = vpop.permute.xlu1 %1156  ;;  %v378_v40 = vsel %vm364_vm4, %v1149_v28, %v1144_v30  ;;  %v377_v41 = vsel %vm364_vm4, %v1148_v29, %v1143_v31  ;;  %v369_v50 = vsel %vm364_vm4, %v1143_v31, %v1148_v29 }
  0xca   : > { %584 = vmatprep.subr.bf16.mxu0 %v416_v51  ;;  %v1152_v36 = vpop.permute.xlu0 %1151  ;;  %v1159_v43 = vunpack.i.h.bf16 %v1157_v35  ;;  %v1158_v45 = vunpack.i.l.bf16 %v1157_v35  ;;  %v1022_v49 = vpack.c.bf16 %v378_v40, %v377_v41  ;;  %v370_v51 = vsel %vm364_vm4, %v1144_v30, %v1149_v28 }
  0xcb   : > { %v1154_v46 = vunpack.i.h.bf16 %v1152_v36  ;;  %v1153_v47 = vunpack.i.l.bf16 %v1152_v36 }
  0xcd   : > { %585 = vmatpush1.bf16.msra.mxu0 %v415_v54  ;;  %v380_v52 = vsel %vm364_vm4, %v1159_v43, %v1154_v46  ;;  %v379_v53 = vsel %vm364_vm4, %v1158_v45, %v1153_v47  ;;  %v433_v54 = vpack.c.bf16 %v370_v51, %v369_v50  ;;  %v371_v56 = vsel %vm364_vm4, %v1153_v47, %v1158_v45 }
  0xce   : > { %586 = vmatprep.subr.bf16.mxu0 %v418_v55  ;;  %v1025_v55 = vpack.c.bf16 %v380_v52, %v379_v53  ;;  %v372_v57 = vsel %vm364_vm4, %v1154_v46, %v1159_v43 }
  0xcf   : > { %v435_v58 = vpack.c.bf16 %v372_v57, %v371_v56 }
  0xd1   : > { %587 = vmatpush1.bf16.msra.mxu0 %v417_v61  ;;  %v1168_v61 = vld [vmem:[%s1773_s1 + $0x24] ss:$8 sps:$4 sm:$0xff]  }
  0xd2   : > { %588 = vmatprep.subr.bf16.mxu0 %v420_v3  ;;  %v1173_v3 = vld [vmem:[%s1773_s1 + $0x30] ss:$8 sps:$4 sm:$0xff]  }
  0xd5   : > { %589 = vmatpush1.bf16.msra.mxu0 %v419_v24 }
  0xd6   : > { %1017 = vmatprep.subr.msk.bf16.mxu0 %vm1610_vm6, %v1016_v23 }
  0xd9   : > { %591 = vmatpush1.bf16.msra.mxu0 %v429_v37 }
  0xda   : > { %1020 = vmatprep.subr.msk.bf16.mxu0 %vm1610_vm6, %v1019_v39  ;;  %v493_v21 = vpop.permute.xlu1 %492 }
  0xdb   : > { %v488_v7 = vpop.permute.xlu0 %487 }
  0xdd   : > { %593 = vmatpush1.bf16.msra.mxu0 %v431_v48 }
  0xde   : > { %1023 = vmatprep.subr.msk.bf16.mxu0 %vm1610_vm6, %v1022_v49  ;;  %v498_v33 = vpop.permute.xlu1 %497 }
  0xdf   : > { %v503_v38 = vpop.permute.xlu0 %502 }
  0xe1   : > { %595 = vmatpush1.bf16.msra.mxu0 %v433_v54 }
  0xe2   : > { %1026 = vmatprep.subr.msk.bf16.mxu0 %vm1610_vm6, %v1025_v55  ;;  %v508_v50 = vpop.permute.xlu1 %507 }
  0xe3   : > { %v513_v55 = vpop.permute.xlu0 %512 }
  0xe5   : > { %597 = vmatpush1.bf16.msra.mxu0 %v435_v58 }
  0xe8   : > { %607 = vmatmul.mubr.bf16.vlgmr.msra.gmra.mrb[0].mxu0 %v1162_v59 }
  0xe9   : > { %985 = vmatprep.mubr.msk.bf16.mxu0 %vm561_vm0, %v1165_v60 }
  0xf0   : > { %617 = vmatmul.mubr.bf16.gmra.mrb[4].mxu0 %v1167_v44 }
  0xf1   : > { %986 = vmatprep.mubr.msk.bf16.mxu0 %vm561_vm0, %v1168_v61 }
  0xf8   : > { %627 = vmatmul.mubr.bf16.gmra.mrb[8].mxu0 %v1170_v62 }
  0xf9   : > { %987 = vmatprep.mubr.msk.bf16.mxu0 %vm561_vm0, %v1171_v63 }
 0x100   : > { %637 = vmatmul.mubr.bf16.gmra.mrb[12].mxu0 %v1173_v3 }
 0x1bb   : > { %v608_v10 = vpop.f32.mrb[0].mxu0 }
 0x1bc   : > { %v609_v11 = vadd.f32 %v608_v10, %v488_v7  ;;  %v610_v18 = vpop.f32.mrb[1].mxu0 }
 0x1bd   : > { %v611_v22 = vadd.f32 %v610_v18, %v488_v7  ;;  %v612_v23 = vpop.f32.mrb[2].mxu0  ;;  %v518_v7 = vpop.permute.xlu1 %517 }
 0x1be   : > { %v613_v24 = vadd.f32 %v612_v23, %v493_v21  ;;  %v614_v25 = vpop.f32.mrb[3].mxu0  ;;  %v647_v28 = vmax.f32 %v609_v11, 0.0 }
 0x1bf   : > { %v615_v26 = vadd.f32 %v614_v25, %v493_v21  ;;  %v648_v30 = vmax.f32 %v611_v22, 0.0  ;;  %v523_v22 = vpop.permute.xlu0 %522 }
 0x1c0   : > { %v649_v29 = vmax.f32 %v613_v24, 0.0 }
 0x1c1   : > { %v650_v31 = vmax.f32 %v615_v26, 0.0 }
 0x1c2   : > { %v671_v32 = vpack.c.bf16 %v649_v29, %v647_v28 }
 0x1c3   : > { %v618_v34 = vpop.f32.mrb[4].mxu0  ;;  %v672_v35 = vpack.c.bf16 %v650_v31, %v648_v30 }
 0x1c4   : > { %v619_v36 = vadd.f32 %v618_v34, %v498_v33  ;;  %v620_v37 = vpop.f32.mrb[5].mxu0 }
 0x1c5   : > { %v621_v39 = vadd.f32 %v620_v37, %v498_v33  ;;  %v622_v40 = vpop.f32.mrb[6].mxu0  ;;  %759 = vmatprep.subr.bf16.mxu1 %v672_v35  ;;  %v1174_v35 = vld [vmem:[%s1775_s3] sm:$0xff]   ;;  %v1176_v37 = vld [vmem:[%s1775_s3 + $0x10] sm:$0xff]  }
 0x1c6   : > { %v623_v41 = vadd.f32 %v622_v40, %v503_v38  ;;  %v624_v42 = vpop.f32.mrb[7].mxu0  ;;  %760 = vmatpush1.bf16.msra.mxu1 %v671_v32  ;;  %v651_v45 = vmax.f32 %v619_v36, 0.0  ;;  %v1175_v36 = vld [vmem:[%s1775_s3 + $0x8] sm:$0xff]  }
 0x1c7   : > { %v625_v43 = vadd.f32 %v624_v42, %v503_v38  ;;  %v652_v47 = vmax.f32 %v621_v39, 0.0  ;;  %v1177_v38 = vld [vmem:[%s1775_s3 + $0x18] sm:$0xff]   ;;  %v690_v39 = vpop.permute.xlu1 %689 }
 0x1c8   : > { %v653_v46 = vmax.f32 %v623_v41, 0.0 }
 0x1c9   : > { %v654_v48 = vmax.f32 %v625_v43, 0.0  ;;  %v695_v43 = vpop.permute.xlu0 %694 }
 0x1ca   : > { %v673_v49 = vpack.c.bf16 %v653_v46, %v651_v45 }
 0x1cb   : > { %v674_v51 = vpack.c.bf16 %v654_v48, %v652_v47  ;;  %v628_v52 = vpop.f32.mrb[8].mxu0 }
 0x1cc   : > { %v629_v53 = vadd.f32 %v628_v52, %v508_v50  ;;  %v630_v54 = vpop.f32.mrb[9].mxu0 }
 0x1cd   : > { %v631_v56 = vadd.f32 %v630_v54, %v508_v50  ;;  %v632_v57 = vpop.f32.mrb[10].mxu0  ;;  %761 = vmatprep.subr.bf16.mxu1 %v674_v51 }
 0x1ce   : > { %v633_v58 = vadd.f32 %v632_v57, %v513_v55  ;;  %v634_v59 = vpop.f32.mrb[11].mxu0  ;;  %762 = vmatpush1.bf16.msra.mxu1 %v673_v49  ;;  %v655_v44 = vmax.f32 %v629_v53, 0.0 }
 0x1cf   : > { %v635_v60 = vadd.f32 %v634_v59, %v513_v55  ;;  %v656_v62 = vmax.f32 %v631_v56, 0.0  ;;  %v705_v55 = vpop.permute.xlu0 %704 }
 0x1d0   : > { %v657_v61 = vmax.f32 %v633_v58, 0.0 }
 0x1d1   : > { %v658_v63 = vmax.f32 %v635_v60, 0.0 }
 0x1d2   : > { %v675_v3 = vpack.c.bf16 %v657_v61, %v655_v44 }
 0x1d3   : > { %v676_v10 = vpack.c.bf16 %v658_v63, %v656_v62  ;;  %v638_v11 = vpop.f32.mrb[12].mxu0 }
 0x1d4   : > { %v639_v18 = vadd.f32 %v638_v11, %v518_v7  ;;  %v640_v21 = vpop.f32.mrb[13].mxu0 }
 0x1d5   : > { %v641_v23 = vadd.f32 %v640_v21, %v518_v7  ;;  %v642_v24 = vpop.f32.mrb[14].mxu0  ;;  %763 = vmatprep.subr.bf16.mxu1 %v676_v10  ;;  %v715_v7 = vpop.permute.xlu0 %714 }
 0x1d6   : > { %v643_v25 = vadd.f32 %v642_v24, %v523_v22  ;;  %v644_v26 = vpop.f32.mrb[15].mxu0  ;;  %764 = vmatpush1.bf16.msra.mxu1 %v675_v3  ;;  %v659_v29 = vmax.f32 %v639_v18, 0.0 }
 0x1d7   : > { %v645_v28 = vadd.f32 %v644_v26, %v523_v22  ;;  %v660_v31 = vmax.f32 %v641_v23, 0.0 }
 0x1d8   : > { %v661_v30 = vmax.f32 %v643_v25, 0.0 }
 0x1d9   : > { %v662_v32 = vmax.f32 %v645_v28, 0.0  ;;  %v725_v28 = vpop.permute.xlu0 %724 }
 0x1da   : > { %v677_v33 = vpack.c.bf16 %v661_v30, %v659_v29 }
 0x1db   : > { %v678_v34 = vpack.c.bf16 %v662_v32, %v660_v31 }
 0x1dd   : > { %765 = vmatprep.subr.bf16.mxu1 %v678_v34 }
 0x1de   : > { %766 = vmatpush1.bf16.msra.mxu1 %v677_v33 }
 0x1e1   : > { %992 = vmatmul.mubr.msk.bf16.vlgmr.msra.gmra.mrb[0].mxu1 %vm561_vm0, %v1174_v35 }
 0x1e2   : > { %801 = vmatprep.mubr.bf16.mxu1 %v1281_v27 }
 0x1e9   : > { %993 = vmatmul.mubr.msk.bf16.gmra.mrb[4].mxu1 %vm561_vm0, %v1175_v36 }
 0x1ea   : > { %811 = vmatprep.mubr.bf16.mxu1 %v1281_v27 }
 0x1f1   : > { %994 = vmatmul.mubr.msk.bf16.gmra.mrb[8].mxu1 %vm561_vm0, %v1176_v37 }
 0x1f2   : > { %821 = vmatprep.mubr.bf16.mxu1 %v1281_v27 }
 0x1f9   : > { %995 = vmatmul.mubr.msk.bf16.gmra.mrb[12].mxu1 %vm561_vm0, %v1177_v38 }
 0x2b4   : > { %v793_v40 = vpop.f32.mrb[0].mxu1 }
 0x2b5   : > { %v794_v41 = vadd.f32 %v793_v40, %v690_v39  ;;  %v795_v42 = vpop.f32.mrb[1].mxu1 }
 0x2b6   : > { %v796_v45 = vadd.f32 %v795_v42, %v690_v39  ;;  %v797_v46 = vpop.f32.mrb[2].mxu1 }
 0x2b7   : > { %v848_v47 = vadd.f32 %v794_v41, %v1433_v2  ;;  %v798_v48 = vadd.f32 %v797_v46, %v695_v43  ;;  %v799_v49 = vpop.f32.mrb[3].mxu1  ;;  %v700_v2 = vpop.permute.xlu1 %699 }
 0x2b8   : > { %v849_v50 = vadd.f32 %v796_v45, %v1445_v8  ;;  %v800_v27 = vadd.f32 %v799_v49, %v695_v43 }
 0x2b9   : > { %864 = vst [vmem:[%s1689_s14] sm:$0xff] %v848_v47  ;;  %v850_v51 = vadd.f32 %v798_v48, %v1437_v4 }
 0x2ba   : > { %865 = vst [vmem:[%s1689_s14 + $0x8] sm:$0xff] %v849_v50  ;;  %v851_v52 = vadd.f32 %v800_v27, %v1447_v9 }
 0x2bb   : > { %866 = vst [vmem:[%s1689_s14 + $0x10] sm:$0xff] %v850_v51  ;;  %v710_v62 = vpop.permute.xlu1 %709 }
 0x2bc   : > { %867 = vst [vmem:[%s1689_s14 + $0x18] sm:$0xff] %v851_v52  ;;  %v803_v8 = vpop.f32.mrb[4].mxu1 }
 0x2bd   : > { %v804_v53 = vadd.f32 %v803_v8, %v700_v2  ;;  %v805_v54 = vpop.f32.mrb[5].mxu1 }
 0x2be   : > { %v806_v56 = vadd.f32 %v805_v54, %v700_v2  ;;  %v807_v57 = vpop.f32.mrb[6].mxu1 }
 0x2bf   : > { %v852_v58 = vadd.f32 %v804_v53, %v1429_v0  ;;  %v808_v59 = vadd.f32 %v807_v57, %v705_v55  ;;  %v809_v4 = vpop.f32.mrb[7].mxu1  ;;  %v720_v24 = vpop.permute.xlu1 %719 }
 0x2c0   : > { %v853_v60 = vadd.f32 %v806_v56, %v1439_v5  ;;  %v810_v44 = vadd.f32 %v809_v4, %v705_v55 }
 0x2c1   : > { %868 = vst [vmem:[%s1689_s14 + $0x20] sm:$0xff] %v852_v58  ;;  %v854_v9 = vadd.f32 %v808_v59, %v1431_v1 }
 0x2c2   : > { %869 = vst [vmem:[%s1689_s14 + $0x28] sm:$0xff] %v853_v60  ;;  %v855_v61 = vadd.f32 %v810_v44, %v1441_v6 }
 0x2c3   : > { %870 = vst [vmem:[%s1689_s14 + $0x30] sm:$0xff] %v854_v9 }
 0x2c4   : > { %871 = vst [vmem:[%s1689_s14 + $0x38] sm:$0xff] %v855_v61  ;;  %v813_v63 = vpop.f32.mrb[8].mxu1 }
 0x2c5   : > { %v814_v3 = vadd.f32 %v813_v63, %v710_v62  ;;  %v815_v0 = vpop.f32.mrb[9].mxu1 }
 0x2c6   : > { %v816_v10 = vadd.f32 %v815_v0, %v710_v62  ;;  %v817_v5 = vpop.f32.mrb[10].mxu1 }
 0x2c7   : > { %v856_v11 = vadd.f32 %v814_v3, %v1457_v14  ;;  %v818_v18 = vadd.f32 %v817_v5, %v715_v7  ;;  %v819_v1 = vpop.f32.mrb[11].mxu1 }
 0x2c8   : > { %v857_v21 = vadd.f32 %v816_v10, %v1453_v12  ;;  %v820_v6 = vadd.f32 %v819_v1, %v715_v7 }
 0x2c9   : > { %872 = vst [vmem:[%s1689_s14 + $0x40] sm:$0xff] %v856_v11  ;;  %v858_v22 = vadd.f32 %v818_v18, %v1459_v15 }
 0x2ca   : > { %873 = vst [vmem:[%s1689_s14 + $0x48] sm:$0xff] %v857_v21  ;;  %v859_v23 = vadd.f32 %v820_v6, %v1455_v13 }
 0x2cb   : > { %874 = vst [vmem:[%s1689_s14 + $0x50] sm:$0xff] %v858_v22 }
 0x2cc   : > { %875 = vst [vmem:[%s1689_s14 + $0x58] sm:$0xff] %v859_v23  ;;  %v823_v25 = vpop.f32.mrb[12].mxu1 }
 0x2cd   : > { %v824_v26 = vadd.f32 %v823_v25, %v720_v24  ;;  %v825_v14 = vpop.f32.mrb[13].mxu1 }
 0x2ce   : > { %v826_v29 = vadd.f32 %v825_v14, %v720_v24  ;;  %v827_v12 = vpop.f32.mrb[14].mxu1 }
 0x2cf   : > { %v860_v15 = vadd.f32 %v824_v26, %v1467_v19  ;;  %v828_v13 = vadd.f32 %v827_v12, %v725_v28  ;;  %v829_v30 = vpop.f32.mrb[15].mxu1 }
 0x2d0   : > { %v861_v31 = vadd.f32 %v826_v29, %v1461_v16  ;;  %v830_v32 = vadd.f32 %v829_v30, %v725_v28 }
 0x2d1   : > { %876 = vst [vmem:[%s1689_s14 + $0x60] sm:$0xff] %v860_v15  ;;  %v862_v33 = vadd.f32 %v828_v13, %v1469_v20 }
 0x2d2   : > { %877 = vst [vmem:[%s1689_s14 + $0x68] sm:$0xff] %v861_v31  ;;  %v863_v19 = vadd.f32 %v830_v32, %v1463_v17 }
 0x2d3   : > { %878 = vst [vmem:[%s1689_s14 + $0x70] sm:$0xff] %v862_v33 }
 0x2d4   : > { %879 = vst [vmem:[%s1689_s14 + $0x78] sm:$0xff] %v863_v19 }
 0x2d5   : > { %1221 = shalt.err (!%p1218_p2)
}
 0x2d6   : > { %s1222_s17 = scalar_lea.hbm %s1722_s7, 2048  ;;  %s1226_s29 = scalar_lea.hbm %s1777_s5, 4096 }
 0x2d7   : > { %p1223_p4 = scmp.ne.s32.totalorder %s1722_s7, %s1222_s17  ;;  %p1227_p9 = scmp.lt.u32.totalorder %s1722_s7, %s1777_s5 }
 0x2d8   : > { %p1228_p1 = scmp.lt.u32.totalorder %s1226_s29, %s1222_s17  ;;  %p1230_p6 = scmp.lt.u32.totalorder %s1222_s17, %s1722_s7 }
 0x2d9   : > { %p1224_p5 = pnand %p1223_p4, %p1788_p11 }
 0x2da   : > { %p1229_p3 = por %p1228_p1, %p1227_p9 }
 0x2db   : > { %p1225_p7 = pneg %p1224_p5 }
 0x2dc   : > { %p1231_p12 = por %p1230_p6, %p1229_p3 }
 0x2de   : > { %p1232_p13 = pnand %p1231_p12, %p1225_p7 }
 0x2e0   : > { %1235 = shalt.err (!%p1232_p13)
}
 0x2e1   : > { %s1283_s25 = smov 256   ;;  %s1284_s16 = smov 16  }
 0x2e2   : > { %1029 = dma.vmem_to_hbm [thread:$0]  (%p1788_p11), %s1724_s15, 2048, %s1722_s7, %s881_s22, %s1283_s25, %s1283_s25, %s1284_s16  }
 0x2e3 PF: > { %s909_s8 = sand.u32 1, %s1262_s18   ;;  %p1789_p8 = scmp.ne.s32.totalorder %s1782_s6, 0 }
 0x2e4   : > { %p1790_p10 = scmp.ge.s32.totalorder %s1274_s21, 2  ;;  %s910_s9 = scalar_lea.sflag [#allocation5], %s909_s8 }
 0x2e6   : > { %p1036_p0 = pnand %p1790_p10, %p1789_p8 }
 0x2e8   : > { %1257 = dma.done.wait (!%p1036_p0), %s910_s9, 2048  }
 0x2e9   : > { %1259 = vsyncadd (!%p1036_p0), %s910_s9, 4294965248  ;;  %p18_p2 = scmp.ge.s32.totalorder %s1340_s24, 4   ;;  %s1791_s18 = smov %s1266_s19 }
 0x2ea   : > { %s1792_s19 = smov %s1270_s20  ;;  %s1793_s20 = smov %s1352_s27 }
 0x2eb   : > { %s1794_s21 = smov %s1340_s24  ;;  %20 = sbr.rel (!%p18_p2) target bundleno = 5 (0x5), region = 85 }
 0x2f2   :  { %915 = vsyncpa [#allocation4], 1 }
 0x2f3   :  { %917 = vsyncpa [#allocation4 + $0x1], 1 }
 0x2f4   :  { %918 = vsyncpa [#allocation5], 1 }
 0x2f5   :  { %920 = vsyncpa [#allocation5 + $0x1], 1 }

</bundles_post_ra>
